<compile_context>
chip_gen: v5e
topology: v5e:2x2
jax: 0.10.0
libtpu: 0.0.40
codegen_flags: <defaults>
</compile_context>

<pallas_src>
import jax
import jax.numpy as jnp
import numpy as np
from jax.experimental import pallas as pl
from jax.experimental.pallas import tpu as pltpu


def _sigmoid(z):
    # Single EUP tanh per call (equivalent to logistic sigmoid).
    return 0.5 * (jnp.tanh(0.5 * z) + 1.0)


def _lstm_kernel(x_ref, wih_ref, whh_ref, b_ref, o_ref):
    # x_ref:   (T, Bt, Din)  time-major batch tile
    # wih_ref: (Din, 4H)     W_ih^T, gate order [i | f | g | o]
    # whh_ref: (H, 4H)       W_hh^T
    # b_ref:   (1, 4H)       b_ih + b_hh
    # o_ref:   (Bt, H)       final hidden state h_T
    T, Bt, Din = x_ref.shape
    H = whh_ref.shape[0]

    # ---- Phase 1: input projection for every timestep in one MXU matmul ----
    x2d = x_ref[...].reshape(T * Bt, Din)                 # t-major rows
    xg = jnp.dot(x2d, wih_ref[...], preferred_element_type=jnp.float32)
    xg = xg + b_ref[...]                                   # (T*Bt, 4H)

    whh = whh_ref[...]

    # ---- Phase 2: sequential recurrence (T is static -> unrolled) ----
    h = jnp.zeros((Bt, H), jnp.float32)
    c = jnp.zeros((Bt, H), jnp.float32)
    for t in range(T):
        gates = xg[t * Bt:(t + 1) * Bt, :] + jnp.dot(
            h, whh, preferred_element_type=jnp.float32)    # (Bt, 4H)
        i_g = _sigmoid(gates[:, 0:H])
        f_g = _sigmoid(gates[:, H:2 * H])
        g_g = jnp.tanh(gates[:, 2 * H:3 * H])
        o_g = _sigmoid(gates[:, 3 * H:4 * H])
        c = f_g * c + i_g * g_g
        h = o_g * jnp.tanh(c)

    o_ref[...] = h.astype(o_ref.dtype)


def process_lstm_forward(x, w_ih, w_hh, b_ih, b_hh, *, batch_tile=8):
    """x: [B, T, Din]; w_ih: [4H, Din]; w_hh: [4H, H]; biases: [4H] -> [B, H]."""
    B, T, Din = x.shape
    H = w_hh.shape[1]

    # Wrapper-side layout plumbing (free): transposed weights, fused bias,
    # time-major + batch-padded input so blocks are (8, lane)-aligned.
    wih_t = jnp.asarray(w_ih, jnp.float32).T               # (Din, 4H)
    whh_t = jnp.asarray(w_hh, jnp.float32).T               # (H, 4H)
    bias = (jnp.asarray(b_ih, jnp.float32) +
            jnp.asarray(b_hh, jnp.float32)).reshape(1, 4 * H)

    Bt = batch_tile
    B_pad = ((B + Bt - 1) // Bt) * Bt
    xt = jnp.transpose(x.astype(jnp.float32), (1, 0, 2))   # (T, B, Din)
    if B_pad != B:
        xt = jnp.pad(xt, ((0, 0), (0, B_pad - B), (0, 0)))

    out = pl.pallas_call(
        _lstm_kernel,
        out_shape=jax.ShapeDtypeStruct((B_pad, H), jnp.float32),
        grid_spec=pltpu.PrefetchScalarGridSpec(
            num_scalar_prefetch=0,
            grid=(B_pad // Bt,),
            in_specs=[
                pl.BlockSpec((T, Bt, Din), lambda b: (0, b, 0)),
                pl.BlockSpec((Din, 4 * H), lambda b: (0, 0)),
                pl.BlockSpec((H, 4 * H), lambda b: (0, 0)),
                pl.BlockSpec((1, 4 * H), lambda b: (0, 0)),
            ],
            out_specs=pl.BlockSpec((Bt, H), lambda b: (b, 0)),
        ),
        compiler_params=pltpu.CompilerParams(
            dimension_semantics=("parallel",)),
    )(xt, wih_t, whh_t, bias)
    return out[:B]


def _reference(x, w_ih, w_hh, b_ih, b_hh):
    B, T, Din = x.shape
    H = w_hh.shape[1]
    wih_t = w_ih.T
    whh_t = w_hh.T
    bias = (b_ih + b_hh).reshape(1, 4 * H)
    h = jnp.zeros((B, H), jnp.float32)
    c = jnp.zeros((B, H), jnp.float32)
    for t in range(T):
        gates = x[:, t, :] @ wih_t + h @ whh_t + bias
        i_g = _sigmoid(gates[:, 0:H])
        f_g = _sigmoid(gates[:, H:2 * H])
        g_g = jnp.tanh(gates[:, 2 * H:3 * H])
        o_g = _sigmoid(gates[:, 3 * H:4 * H])
        c = f_g * c + i_g * g_g
        h = o_g * jnp.tanh(c)
    return h   # == out[:, -1, :]


if __name__ == "__main__":
    B, T, Din, H = 2, 8, 16, 32

    key = jax.random.PRNGKey(0)
    k_x, k_wih, k_whh, k_bih, k_bhh = jax.random.split(key, 5)

    # PyTorch nn.LSTM default init: U(-1/sqrt(H), 1/sqrt(H)) for all params.
    bound = 1.0 / np.sqrt(H)
    w_ih = jax.random.uniform(k_wih, (4 * H, Din), jnp.float32, -bound, bound)
    w_hh = jax.random.uniform(k_whh, (4 * H, H), jnp.float32, -bound, bound)
    b_ih = jax.random.uniform(k_bih, (4 * H,), jnp.float32, -bound, bound)
    b_hh = jax.random.uniform(k_bhh, (4 * H,), jnp.float32, -bound, bound)

    x = jax.random.normal(k_x, (B, T, Din), jnp.float32)

    out = process_lstm_forward(x, w_ih, w_hh, b_ih, b_hh)
    out = jax.block_until_ready(out)

    ref = _reference(x, w_ih, w_hh, b_ih, b_hh)
    np.testing.assert_allclose(np.asarray(out), np.asarray(ref),
                               rtol=1e-5, atol=1e-5)
    print("KERNEL_OK")
</pallas_src>

<mosaic_0001>
module attributes {stable_mosaic.version = 11 : i64} {
  func.func @_lstm_kernel(%arg0: i32, %arg1: memref<8x8x16xf32, #tpu.memory_space<vmem>>, %arg2: memref<16x128xf32, #tpu.memory_space<vmem>>, %arg3: memref<32x128xf32, #tpu.memory_space<vmem>>, %arg4: memref<1x128xf32, #tpu.memory_space<vmem>>, %arg5: memref<8x32xf32, #tpu.memory_space<vmem>>) attributes {dimension_semantics = [#tpu.dimension_semantics<parallel>], iteration_bounds = array<i64: 1>, scalar_prefetch = 0 : i64, scratch_operands = 0 : i64, tpu.core_type = #tpu.core_type<tc>, window_params = [{transform_indices = @transform_0, window_bounds = array<i64: 8, 8, 16>}, {pipeline_mode = #tpu.pipeline_mode<synchronous>, transform_indices = @transform_1, window_bounds = array<i64: 16, 128>}, {pipeline_mode = #tpu.pipeline_mode<synchronous>, transform_indices = @transform_2, window_bounds = array<i64: 32, 128>}, {pipeline_mode = #tpu.pipeline_mode<synchronous>, transform_indices = @transform_3, window_bounds = array<i64: 1, 128>}, {transform_indices = @transform_4, window_bounds = array<i64: 8, 32>}]} {
    %c0 = arith.constant 0 : index
    %c0_0 = arith.constant 0 : index
    %c0_1 = arith.constant 0 : index
    %0 = vector.load %arg1[%c0, %c0_0, %c0_1] : memref<8x8x16xf32, #tpu.memory_space<vmem>>, vector<8x8x16xf32>
    %1 = vector.shape_cast %0 : vector<8x8x16xf32> to vector<64x16xf32>
    %c0_2 = arith.constant 0 : index
    %c0_3 = arith.constant 0 : index
    %2 = vector.load %arg2[%c0_2, %c0_3] : memref<16x128xf32, #tpu.memory_space<vmem>>, vector<16x128xf32>
    %cst = arith.constant dense<0.000000e+00> : vector<64x128xf32>
    %3 = tpu.matmul %1, %2, %cst {dimension_numbers = #tpu.dot_dimension_numbers<[1], [0], [0], [1], [0, 0, 1, 1], [], []>} : vector<64x16xf32>, vector<16x128xf32>, vector<64x128xf32> -> vector<64x128xf32>
    %c0_4 = arith.constant 0 : index
    %c0_5 = arith.constant 0 : index
    %4 = vector.load %arg4[%c0_4, %c0_5] : memref<1x128xf32, #tpu.memory_space<vmem>>, vector<1x128xf32>
    %5 = vector.broadcast %4 : vector<1x128xf32> to vector<64x128xf32>
    %6 = arith.addf %3, %5 : vector<64x128xf32>
    %c0_6 = arith.constant 0 : index
    %c0_7 = arith.constant 0 : index
    %7 = vector.load %arg3[%c0_6, %c0_7] : memref<32x128xf32, #tpu.memory_space<vmem>>, vector<32x128xf32>
    %cst_8 = arith.constant 0.000000e+00 : f32
    %8 = vector.broadcast %cst_8 : f32 to vector<8x32xf32>
    %cst_9 = arith.constant 0.000000e+00 : f32
    %9 = vector.broadcast %cst_9 : f32 to vector<8x32xf32>
    %10 = vector.extract_strided_slice %6 {offsets = [0, 0], sizes = [8, 128], strides = [1, 1]} : vector<64x128xf32> to vector<8x128xf32>
    %cst_10 = arith.constant dense<0.000000e+00> : vector<8x128xf32>
    %11 = tpu.matmul %8, %7, %cst_10 {dimension_numbers = #tpu.dot_dimension_numbers<[1], [0], [0], [1], [0, 0, 1, 1], [], []>} : vector<8x32xf32>, vector<32x128xf32>, vector<8x128xf32> -> vector<8x128xf32>
    %12 = arith.addf %10, %11 : vector<8x128xf32>
    %13 = vector.extract_strided_slice %12 {offsets = [0, 0], sizes = [8, 32], strides = [1, 1]} : vector<8x128xf32> to vector<8x32xf32>
    %cst_11 = arith.constant 5.000000e-01 : f32
    %14 = vector.broadcast %cst_11 : f32 to vector<8x32xf32>
    %15 = arith.mulf %14, %13 : vector<8x32xf32>
    %16 = math.tanh %15 : vector<8x32xf32>
    %cst_12 = arith.constant 1.000000e+00 : f32
    %17 = vector.broadcast %cst_12 : f32 to vector<8x32xf32>
    %18 = arith.addf %16, %17 : vector<8x32xf32>
    %cst_13 = arith.constant 5.000000e-01 : f32
    %19 = vector.broadcast %cst_13 : f32 to vector<8x32xf32>
    %20 = arith.mulf %19, %18 : vector<8x32xf32>
    %21 = vector.extract_strided_slice %12 {offsets = [0, 32], sizes = [8, 32], strides = [1, 1]} : vector<8x128xf32> to vector<8x32xf32>
    %cst_14 = arith.constant 5.000000e-01 : f32
    %22 = vector.broadcast %cst_14 : f32 to vector<8x32xf32>
    %23 = arith.mulf %22, %21 : vector<8x32xf32>
    %24 = math.tanh %23 : vector<8x32xf32>
    %cst_15 = arith.constant 1.000000e+00 : f32
    %25 = vector.broadcast %cst_15 : f32 to vector<8x32xf32>
    %26 = arith.addf %24, %25 : vector<8x32xf32>
    %cst_16 = arith.constant 5.000000e-01 : f32
    %27 = vector.broadcast %cst_16 : f32 to vector<8x32xf32>
    %28 = arith.mulf %27, %26 : vector<8x32xf32>
    %29 = vector.extract_strided_slice %12 {offsets = [0, 64], sizes = [8, 32], strides = [1, 1]} : vector<8x128xf32> to vector<8x32xf32>
    %30 = math.tanh %29 : vector<8x32xf32>
    %31 = vector.extract_strided_slice %12 {offsets = [0, 96], sizes = [8, 32], strides = [1, 1]} : vector<8x128xf32> to vector<8x32xf32>
    %cst_17 = arith.constant 5.000000e-01 : f32
    %32 = vector.broadcast %cst_17 : f32 to vector<8x32xf32>
    %33 = arith.mulf %32, %31 : vector<8x32xf32>
    %34 = math.tanh %33 : vector<8x32xf32>
    %cst_18 = arith.constant 1.000000e+00 : f32
    %35 = vector.broadcast %cst_18 : f32 to vector<8x32xf32>
    %36 = arith.addf %34, %35 : vector<8x32xf32>
    %cst_19 = arith.constant 5.000000e-01 : f32
    %37 = vector.broadcast %cst_19 : f32 to vector<8x32xf32>
    %38 = arith.mulf %37, %36 : vector<8x32xf32>
    %39 = arith.mulf %28, %9 : vector<8x32xf32>
    %40 = arith.mulf %20, %30 : vector<8x32xf32>
    %41 = arith.addf %39, %40 : vector<8x32xf32>
    %42 = math.tanh %41 : vector<8x32xf32>
    %43 = arith.mulf %38, %42 : vector<8x32xf32>
    %44 = vector.extract_strided_slice %6 {offsets = [8, 0], sizes = [8, 128], strides = [1, 1]} : vector<64x128xf32> to vector<8x128xf32>
    %cst_20 = arith.constant dense<0.000000e+00> : vector<8x128xf32>
    %45 = tpu.matmul %43, %7, %cst_20 {dimension_numbers = #tpu.dot_dimension_numbers<[1], [0], [0], [1], [0, 0, 1, 1], [], []>} : vector<8x32xf32>, vector<32x128xf32>, vector<8x128xf32> -> vector<8x128xf32>
    %46 = arith.addf %44, %45 : vector<8x128xf32>
    %47 = vector.extract_strided_slice %46 {offsets = [0, 0], sizes = [8, 32], strides = [1, 1]} : vector<8x128xf32> to vector<8x32xf32>
    %cst_21 = arith.constant 5.000000e-01 : f32
    %48 = vector.broadcast %cst_21 : f32 to vector<8x32xf32>
    %49 = arith.mulf %48, %47 : vector<8x32xf32>
    %50 = math.tanh %49 : vector<8x32xf32>
    %cst_22 = arith.constant 1.000000e+00 : f32
    %51 = vector.broadcast %cst_22 : f32 to vector<8x32xf32>
    %52 = arith.addf %50, %51 : vector<8x32xf32>
    %cst_23 = arith.constant 5.000000e-01 : f32
    %53 = vector.broadcast %cst_23 : f32 to vector<8x32xf32>
    %54 = arith.mulf %53, %52 : vector<8x32xf32>
    %55 = vector.extract_strided_slice %46 {offsets = [0, 32], sizes = [8, 32], strides = [1, 1]} : vector<8x128xf32> to vector<8x32xf32>
    %cst_24 = arith.constant 5.000000e-01 : f32
    %56 = vector.broadcast %cst_24 : f32 to vector<8x32xf32>
    %57 = arith.mulf %56, %55 : vector<8x32xf32>
    %58 = math.tanh %57 : vector<8x32xf32>
    %cst_25 = arith.constant 1.000000e+00 : f32
    %59 = vector.broadcast %cst_25 : f32 to vector<8x32xf32>
    %60 = arith.addf %58, %59 : vector<8x32xf32>
    %cst_26 = arith.constant 5.000000e-01 : f32
    %61 = vector.broadcast %cst_26 : f32 to vector<8x32xf32>
    %62 = arith.mulf %61, %60 : vector<8x32xf32>
    %63 = vector.extract_strided_slice %46 {offsets = [0, 64], sizes = [8, 32], strides = [1, 1]} : vector<8x128xf32> to vector<8x32xf32>
    %64 = math.tanh %63 : vector<8x32xf32>
    %65 = vector.extract_strided_slice %46 {offsets = [0, 96], sizes = [8, 32], strides = [1, 1]} : vector<8x128xf32> to vector<8x32xf32>
    %cst_27 = arith.constant 5.000000e-01 : f32
    %66 = vector.broadcast %cst_27 : f32 to vector<8x32xf32>
    %67 = arith.mulf %66, %65 : vector<8x32xf32>
    %68 = math.tanh %67 : vector<8x32xf32>
    %cst_28 = arith.constant 1.000000e+00 : f32
    %69 = vector.broadcast %cst_28 : f32 to vector<8x32xf32>
    %70 = arith.addf %68, %69 : vector<8x32xf32>
    %cst_29 = arith.constant 5.000000e-01 : f32
    %71 = vector.broadcast %cst_29 : f32 to vector<8x32xf32>
    %72 = arith.mulf %71, %70 : vector<8x32xf32>
    %73 = arith.mulf %62, %41 : vector<8x32xf32>
    %74 = arith.mulf %54, %64 : vector<8x32xf32>
    %75 = arith.addf %73, %74 : vector<8x32xf32>
    %76 = math.tanh %75 : vector<8x32xf32>
    %77 = arith.mulf %72, %76 : vector<8x32xf32>
    %78 = vector.extract_strided_slice %6 {offsets = [16, 0], sizes = [8, 128], strides = [1, 1]} : vector<64x128xf32> to vector<8x128xf32>
    %cst_30 = arith.constant dense<0.000000e+00> : vector<8x128xf32>
    %79 = tpu.matmul %77, %7, %cst_30 {dimension_numbers = #tpu.dot_dimension_numbers<[1], [0], [0], [1], [0, 0, 1, 1], [], []>} : vector<8x32xf32>, vector<32x128xf32>, vector<8x128xf32> -> vector<8x128xf32>
    %80 = arith.addf %78, %79 : vector<8x128xf32>
    %81 = vector.extract_strided_slice %80 {offsets = [0, 0], sizes = [8, 32], strides = [1, 1]} : vector<8x128xf32> to vector<8x32xf32>
    %cst_31 = arith.constant 5.000000e-01 : f32
    %82 = vector.broadcast %cst_31 : f32 to vector<8x32xf32>
    %83 = arith.mulf %82, %81 : vector<8x32xf32>
    %84 = math.tanh %83 : vector<8x32xf32>
    %cst_32 = arith.constant 1.000000e+00 : f32
    %85 = vector.broadcast %cst_32 : f32 to vector<8x32xf32>
    %86 = arith.addf %84, %85 : vector<8x32xf32>
    %cst_33 = arith.constant 5.000000e-01 : f32
    %87 = vector.broadcast %cst_33 : f32 to vector<8x32xf32>
    %88 = arith.mulf %87, %86 : vector<8x32xf32>
    %89 = vector.extract_strided_slice %80 {offsets = [0, 32], sizes = [8, 32], strides = [1, 1]} : vector<8x128xf32> to vector<8x32xf32>
    %cst_34 = arith.constant 5.000000e-01 : f32
    %90 = vector.broadcast %cst_34 : f32 to vector<8x32xf32>
    %91 = arith.mulf %90, %89 : vector<8x32xf32>
    %92 = math.tanh %91 : vector<8x32xf32>
    %cst_35 = arith.constant 1.000000e+00 : f32
    %93 = vector.broadcast %cst_35 : f32 to vector<8x32xf32>
    %94 = arith.addf %92, %93 : vector<8x32xf32>
    %cst_36 = arith.constant 5.000000e-01 : f32
    %95 = vector.broadcast %cst_36 : f32 to vector<8x32xf32>
    %96 = arith.mulf %95, %94 : vector<8x32xf32>
    %97 = vector.extract_strided_slice %80 {offsets = [0, 64], sizes = [8, 32], strides = [1, 1]} : vector<8x128xf32> to vector<8x32xf32>
    %98 = math.tanh %97 : vector<8x32xf32>
    %99 = vector.extract_strided_slice %80 {offsets = [0, 96], sizes = [8, 32], strides = [1, 1]} : vector<8x128xf32> to vector<8x32xf32>
    %cst_37 = arith.constant 5.000000e-01 : f32
    %100 = vector.broadcast %cst_37 : f32 to vector<8x32xf32>
    %101 = arith.mulf %100, %99 : vector<8x32xf32>
    %102 = math.tanh %101 : vector<8x32xf32>
    %cst_38 = arith.constant 1.000000e+00 : f32
    %103 = vector.broadcast %cst_38 : f32 to vector<8x32xf32>
    %104 = arith.addf %102, %103 : vector<8x32xf32>
    %cst_39 = arith.constant 5.000000e-01 : f32
    %105 = vector.broadcast %cst_39 : f32 to vector<8x32xf32>
    %106 = arith.mulf %105, %104 : vector<8x32xf32>
    %107 = arith.mulf %96, %75 : vector<8x32xf32>
    %108 = arith.mulf %88, %98 : vector<8x32xf32>
    %109 = arith.addf %107, %108 : vector<8x32xf32>
    %110 = math.tanh %109 : vector<8x32xf32>
    %111 = arith.mulf %106, %110 : vector<8x32xf32>
    %112 = vector.extract_strided_slice %6 {offsets = [24, 0], sizes = [8, 128], strides = [1, 1]} : vector<64x128xf32> to vector<8x128xf32>
    %cst_40 = arith.constant dense<0.000000e+00> : vector<8x128xf32>
    %113 = tpu.matmul %111, %7, %cst_40 {dimension_numbers = #tpu.dot_dimension_numbers<[1], [0], [0], [1], [0, 0, 1, 1], [], []>} : vector<8x32xf32>, vector<32x128xf32>, vector<8x128xf32> -> vector<8x128xf32>
    %114 = arith.addf %112, %113 : vector<8x128xf32>
    %115 = vector.extract_strided_slice %114 {offsets = [0, 0], sizes = [8, 32], strides = [1, 1]} : vector<8x128xf32> to vector<8x32xf32>
    %cst_41 = arith.constant 5.000000e-01 : f32
    %116 = vector.broadcast %cst_41 : f32 to vector<8x32xf32>
    %117 = arith.mulf %116, %115 : vector<8x32xf32>
    %118 = math.tanh %117 : vector<8x32xf32>
    %cst_42 = arith.constant 1.000000e+00 : f32
    %119 = vector.broadcast %cst_42 : f32 to vector<8x32xf32>
    %120 = arith.addf %118, %119 : vector<8x32xf32>
    %cst_43 = arith.constant 5.000000e-01 : f32
    %121 = vector.broadcast %cst_43 : f32 to vector<8x32xf32>
    %122 = arith.mulf %121, %120 : vector<8x32xf32>
    %123 = vector.extract_strided_slice %114 {offsets = [0, 32], sizes = [8, 32], strides = [1, 1]} : vector<8x128xf32> to vector<8x32xf32>
    %cst_44 = arith.constant 5.000000e-01 : f32
    %124 = vector.broadcast %cst_44 : f32 to vector<8x32xf32>
    %125 = arith.mulf %124, %123 : vector<8x32xf32>
    %126 = math.tanh %125 : vector<8x32xf32>
    %cst_45 = arith.constant 1.000000e+00 : f32
    %127 = vector.broadcast %cst_45 : f32 to vector<8x32xf32>
    %128 = arith.addf %126, %127 : vector<8x32xf32>
    %cst_46 = arith.constant 5.000000e-01 : f32
    %129 = vector.broadcast %cst_46 : f32 to vector<8x32xf32>
    %130 = arith.mulf %129, %128 : vector<8x32xf32>
    %131 = vector.extract_strided_slice %114 {offsets = [0, 64], sizes = [8, 32], strides = [1, 1]} : vector<8x128xf32> to vector<8x32xf32>
    %132 = math.tanh %131 : vector<8x32xf32>
    %133 = vector.extract_strided_slice %114 {offsets = [0, 96], sizes = [8, 32], strides = [1, 1]} : vector<8x128xf32> to vector<8x32xf32>
    %cst_47 = arith.constant 5.000000e-01 : f32
    %134 = vector.broadcast %cst_47 : f32 to vector<8x32xf32>
    %135 = arith.mulf %134, %133 : vector<8x32xf32>
    %136 = math.tanh %135 : vector<8x32xf32>
    %cst_48 = arith.constant 1.000000e+00 : f32
    %137 = vector.broadcast %cst_48 : f32 to vector<8x32xf32>
    %138 = arith.addf %136, %137 : vector<8x32xf32>
    %cst_49 = arith.constant 5.000000e-01 : f32
    %139 = vector.broadcast %cst_49 : f32 to vector<8x32xf32>
    %140 = arith.mulf %139, %138 : vector<8x32xf32>
    %141 = arith.mulf %130, %109 : vector<8x32xf32>
    %142 = arith.mulf %122, %132 : vector<8x32xf32>
    %143 = arith.addf %141, %142 : vector<8x32xf32>
    %144 = math.tanh %143 : vector<8x32xf32>
    %145 = arith.mulf %140, %144 : vector<8x32xf32>
    %146 = vector.extract_strided_slice %6 {offsets = [32, 0], sizes = [8, 128], strides = [1, 1]} : vector<64x128xf32> to vector<8x128xf32>
    %cst_50 = arith.constant dense<0.000000e+00> : vector<8x128xf32>
    %147 = tpu.matmul %145, %7, %cst_50 {dimension_numbers = #tpu.dot_dimension_numbers<[1], [0], [0], [1], [0, 0, 1, 1], [], []>} : vector<8x32xf32>, vector<32x128xf32>, vector<8x128xf32> -> vector<8x128xf32>
    %148 = arith.addf %146, %147 : vector<8x128xf32>
    %149 = vector.extract_strided_slice %148 {offsets = [0, 0], sizes = [8, 32], strides = [1, 1]} : vector<8x128xf32> to vector<8x32xf32>
    %cst_51 = arith.constant 5.000000e-01 : f32
    %150 = vector.broadcast %cst_51 : f32 to vector<8x32xf32>
    %151 = arith.mulf %150, %149 : vector<8x32xf32>
    %152 = math.tanh %151 : vector<8x32xf32>
    %cst_52 = arith.constant 1.000000e+00 : f32
    %153 = vector.broadcast %cst_52 : f32 to vector<8x32xf32>
    %154 = arith.addf %152, %153 : vector<8x32xf32>
    %cst_53 = arith.constant 5.000000e-01 : f32
    %155 = vector.broadcast %cst_53 : f32 to vector<8x32xf32>
    %156 = arith.mulf %155, %154 : vector<8x32xf32>
    %157 = vector.extract_strided_slice %148 {offsets = [0, 32], sizes = [8, 32], strides = [1, 1]} : vector<8x128xf32> to vector<8x32xf32>
    %cst_54 = arith.constant 5.000000e-01 : f32
    %158 = vector.broadcast %cst_54 : f32 to vector<8x32xf32>
    %159 = arith.mulf %158, %157 : vector<8x32xf32>
    %160 = math.tanh %159 : vector<8x32xf32>
    %cst_55 = arith.constant 1.000000e+00 : f32
    %161 = vector.broadcast %cst_55 : f32 to vector<8x32xf32>
    %162 = arith.addf %160, %161 : vector<8x32xf32>
    %cst_56 = arith.constant 5.000000e-01 : f32
    %163 = vector.broadcast %cst_56 : f32 to vector<8x32xf32>
    %164 = arith.mulf %163, %162 : vector<8x32xf32>
    %165 = vector.extract_strided_slice %148 {offsets = [0, 64], sizes = [8, 32], strides = [1, 1]} : vector<8x128xf32> to vector<8x32xf32>
    %166 = math.tanh %165 : vector<8x32xf32>
    %167 = vector.extract_strided_slice %148 {offsets = [0, 96], sizes = [8, 32], strides = [1, 1]} : vector<8x128xf32> to vector<8x32xf32>
    %cst_57 = arith.constant 5.000000e-01 : f32
    %168 = vector.broadcast %cst_57 : f32 to vector<8x32xf32>
    %169 = arith.mulf %168, %167 : vector<8x32xf32>
    %170 = math.tanh %169 : vector<8x32xf32>
    %cst_58 = arith.constant 1.000000e+00 : f32
    %171 = vector.broadcast %cst_58 : f32 to vector<8x32xf32>
    %172 = arith.addf %170, %171 : vector<8x32xf32>
    %cst_59 = arith.constant 5.000000e-01 : f32
    %173 = vector.broadcast %cst_59 : f32 to vector<8x32xf32>
    %174 = arith.mulf %173, %172 : vector<8x32xf32>
    %175 = arith.mulf %164, %143 : vector<8x32xf32>
    %176 = arith.mulf %156, %166 : vector<8x32xf32>
    %177 = arith.addf %175, %176 : vector<8x32xf32>
    %178 = math.tanh %177 : vector<8x32xf32>
    %179 = arith.mulf %174, %178 : vector<8x32xf32>
    %180 = vector.extract_strided_slice %6 {offsets = [40, 0], sizes = [8, 128], strides = [1, 1]} : vector<64x128xf32> to vector<8x128xf32>
    %cst_60 = arith.constant dense<0.000000e+00> : vector<8x128xf32>
    %181 = tpu.matmul %179, %7, %cst_60 {dimension_numbers = #tpu.dot_dimension_numbers<[1], [0], [0], [1], [0, 0, 1, 1], [], []>} : vector<8x32xf32>, vector<32x128xf32>, vector<8x128xf32> -> vector<8x128xf32>
    %182 = arith.addf %180, %181 : vector<8x128xf32>
    %183 = vector.extract_strided_slice %182 {offsets = [0, 0], sizes = [8, 32], strides = [1, 1]} : vector<8x128xf32> to vector<8x32xf32>
    %cst_61 = arith.constant 5.000000e-01 : f32
    %184 = vector.broadcast %cst_61 : f32 to vector<8x32xf32>
    %185 = arith.mulf %184, %183 : vector<8x32xf32>
    %186 = math.tanh %185 : vector<8x32xf32>
    %cst_62 = arith.constant 1.000000e+00 : f32
    %187 = vector.broadcast %cst_62 : f32 to vector<8x32xf32>
    %188 = arith.addf %186, %187 : vector<8x32xf32>
    %cst_63 = arith.constant 5.000000e-01 : f32
    %189 = vector.broadcast %cst_63 : f32 to vector<8x32xf32>
    %190 = arith.mulf %189, %188 : vector<8x32xf32>
    %191 = vector.extract_strided_slice %182 {offsets = [0, 32], sizes = [8, 32], strides = [1, 1]} : vector<8x128xf32> to vector<8x32xf32>
    %cst_64 = arith.constant 5.000000e-01 : f32
    %192 = vector.broadcast %cst_64 : f32 to vector<8x32xf32>
    %193 = arith.mulf %192, %191 : vector<8x32xf32>
    %194 = math.tanh %193 : vector<8x32xf32>
    %cst_65 = arith.constant 1.000000e+00 : f32
    %195 = vector.broadcast %cst_65 : f32 to vector<8x32xf32>
    %196 = arith.addf %194, %195 : vector<8x32xf32>
    %cst_66 = arith.constant 5.000000e-01 : f32
    %197 = vector.broadcast %cst_66 : f32 to vector<8x32xf32>
    %198 = arith.mulf %197, %196 : vector<8x32xf32>
    %199 = vector.extract_strided_slice %182 {offsets = [0, 64], sizes = [8, 32], strides = [1, 1]} : vector<8x128xf32> to vector<8x32xf32>
    %200 = math.tanh %199 : vector<8x32xf32>
    %201 = vector.extract_strided_slice %182 {offsets = [0, 96], sizes = [8, 32], strides = [1, 1]} : vector<8x128xf32> to vector<8x32xf32>
    %cst_67 = arith.constant 5.000000e-01 : f32
    %202 = vector.broadcast %cst_67 : f32 to vector<8x32xf32>
    %203 = arith.mulf %202, %201 : vector<8x32xf32>
    %204 = math.tanh %203 : vector<8x32xf32>
    %cst_68 = arith.constant 1.000000e+00 : f32
    %205 = vector.broadcast %cst_68 : f32 to vector<8x32xf32>
    %206 = arith.addf %204, %205 : vector<8x32xf32>
    %cst_69 = arith.constant 5.000000e-01 : f32
    %207 = vector.broadcast %cst_69 : f32 to vector<8x32xf32>
    %208 = arith.mulf %207, %206 : vector<8x32xf32>
    %209 = arith.mulf %198, %177 : vector<8x32xf32>
    %210 = arith.mulf %190, %200 : vector<8x32xf32>
    %211 = arith.addf %209, %210 : vector<8x32xf32>
    %212 = math.tanh %211 : vector<8x32xf32>
    %213 = arith.mulf %208, %212 : vector<8x32xf32>
    %214 = vector.extract_strided_slice %6 {offsets = [48, 0], sizes = [8, 128], strides = [1, 1]} : vector<64x128xf32> to vector<8x128xf32>
    %cst_70 = arith.constant dense<0.000000e+00> : vector<8x128xf32>
    %215 = tpu.matmul %213, %7, %cst_70 {dimension_numbers = #tpu.dot_dimension_numbers<[1], [0], [0], [1], [0, 0, 1, 1], [], []>} : vector<8x32xf32>, vector<32x128xf32>, vector<8x128xf32> -> vector<8x128xf32>
    %216 = arith.addf %214, %215 : vector<8x128xf32>
    %217 = vector.extract_strided_slice %216 {offsets = [0, 0], sizes = [8, 32], strides = [1, 1]} : vector<8x128xf32> to vector<8x32xf32>
    %cst_71 = arith.constant 5.000000e-01 : f32
    %218 = vector.broadcast %cst_71 : f32 to vector<8x32xf32>
    %219 = arith.mulf %218, %217 : vector<8x32xf32>
    %220 = math.tanh %219 : vector<8x32xf32>
    %cst_72 = arith.constant 1.000000e+00 : f32
    %221 = vector.broadcast %cst_72 : f32 to vector<8x32xf32>
    %222 = arith.addf %220, %221 : vector<8x32xf32>
    %cst_73 = arith.constant 5.000000e-01 : f32
    %223 = vector.broadcast %cst_73 : f32 to vector<8x32xf32>
    %224 = arith.mulf %223, %222 : vector<8x32xf32>
    %225 = vector.extract_strided_slice %216 {offsets = [0, 32], sizes = [8, 32], strides = [1, 1]} : vector<8x128xf32> to vector<8x32xf32>
    %cst_74 = arith.constant 5.000000e-01 : f32
    %226 = vector.broadcast %cst_74 : f32 to vector<8x32xf32>
    %227 = arith.mulf %226, %225 : vector<8x32xf32>
    %228 = math.tanh %227 : vector<8x32xf32>
    %cst_75 = arith.constant 1.000000e+00 : f32
    %229 = vector.broadcast %cst_75 : f32 to vector<8x32xf32>
    %230 = arith.addf %228, %229 : vector<8x32xf32>
    %cst_76 = arith.constant 5.000000e-01 : f32
    %231 = vector.broadcast %cst_76 : f32 to vector<8x32xf32>
    %232 = arith.mulf %231, %230 : vector<8x32xf32>
    %233 = vector.extract_strided_slice %216 {offsets = [0, 64], sizes = [8, 32], strides = [1, 1]} : vector<8x128xf32> to vector<8x32xf32>
    %234 = math.tanh %233 : vector<8x32xf32>
    %235 = vector.extract_strided_slice %216 {offsets = [0, 96], sizes = [8, 32], strides = [1, 1]} : vector<8x128xf32> to vector<8x32xf32>
    %cst_77 = arith.constant 5.000000e-01 : f32
    %236 = vector.broadcast %cst_77 : f32 to vector<8x32xf32>
    %237 = arith.mulf %236, %235 : vector<8x32xf32>
    %238 = math.tanh %237 : vector<8x32xf32>
    %cst_78 = arith.constant 1.000000e+00 : f32
    %239 = vector.broadcast %cst_78 : f32 to vector<8x32xf32>
    %240 = arith.addf %238, %239 : vector<8x32xf32>
    %cst_79 = arith.constant 5.000000e-01 : f32
    %241 = vector.broadcast %cst_79 : f32 to vector<8x32xf32>
    %242 = arith.mulf %241, %240 : vector<8x32xf32>
    %243 = arith.mulf %232, %211 : vector<8x32xf32>
    %244 = arith.mulf %224, %234 : vector<8x32xf32>
    %245 = arith.addf %243, %244 : vector<8x32xf32>
    %246 = math.tanh %245 : vector<8x32xf32>
    %247 = arith.mulf %242, %246 : vector<8x32xf32>
    %248 = vector.extract_strided_slice %6 {offsets = [56, 0], sizes = [8, 128], strides = [1, 1]} : vector<64x128xf32> to vector<8x128xf32>
    %cst_80 = arith.constant dense<0.000000e+00> : vector<8x128xf32>
    %249 = tpu.matmul %247, %7, %cst_80 {dimension_numbers = #tpu.dot_dimension_numbers<[1], [0], [0], [1], [0, 0, 1, 1], [], []>} : vector<8x32xf32>, vector<32x128xf32>, vector<8x128xf32> -> vector<8x128xf32>
    %250 = arith.addf %248, %249 : vector<8x128xf32>
    %251 = vector.extract_strided_slice %250 {offsets = [0, 0], sizes = [8, 32], strides = [1, 1]} : vector<8x128xf32> to vector<8x32xf32>
    %cst_81 = arith.constant 5.000000e-01 : f32
    %252 = vector.broadcast %cst_81 : f32 to vector<8x32xf32>
    %253 = arith.mulf %252, %251 : vector<8x32xf32>
    %254 = math.tanh %253 : vector<8x32xf32>
    %cst_82 = arith.constant 1.000000e+00 : f32
    %255 = vector.broadcast %cst_82 : f32 to vector<8x32xf32>
    %256 = arith.addf %254, %255 : vector<8x32xf32>
    %cst_83 = arith.constant 5.000000e-01 : f32
    %257 = vector.broadcast %cst_83 : f32 to vector<8x32xf32>
    %258 = arith.mulf %257, %256 : vector<8x32xf32>
    %259 = vector.extract_strided_slice %250 {offsets = [0, 32], sizes = [8, 32], strides = [1, 1]} : vector<8x128xf32> to vector<8x32xf32>
    %cst_84 = arith.constant 5.000000e-01 : f32
    %260 = vector.broadcast %cst_84 : f32 to vector<8x32xf32>
    %261 = arith.mulf %260, %259 : vector<8x32xf32>
    %262 = math.tanh %261 : vector<8x32xf32>
    %cst_85 = arith.constant 1.000000e+00 : f32
    %263 = vector.broadcast %cst_85 : f32 to vector<8x32xf32>
    %264 = arith.addf %262, %263 : vector<8x32xf32>
    %cst_86 = arith.constant 5.000000e-01 : f32
    %265 = vector.broadcast %cst_86 : f32 to vector<8x32xf32>
    %266 = arith.mulf %265, %264 : vector<8x32xf32>
    %267 = vector.extract_strided_slice %250 {offsets = [0, 64], sizes = [8, 32], strides = [1, 1]} : vector<8x128xf32> to vector<8x32xf32>
    %268 = math.tanh %267 : vector<8x32xf32>
    %269 = vector.extract_strided_slice %250 {offsets = [0, 96], sizes = [8, 32], strides = [1, 1]} : vector<8x128xf32> to vector<8x32xf32>
    %cst_87 = arith.constant 5.000000e-01 : f32
    %270 = vector.broadcast %cst_87 : f32 to vector<8x32xf32>
    %271 = arith.mulf %270, %269 : vector<8x32xf32>
    %272 = math.tanh %271 : vector<8x32xf32>
    %cst_88 = arith.constant 1.000000e+00 : f32
    %273 = vector.broadcast %cst_88 : f32 to vector<8x32xf32>
    %274 = arith.addf %272, %273 : vector<8x32xf32>
    %cst_89 = arith.constant 5.000000e-01 : f32
    %275 = vector.broadcast %cst_89 : f32 to vector<8x32xf32>
    %276 = arith.mulf %275, %274 : vector<8x32xf32>
    %277 = arith.mulf %266, %245 : vector<8x32xf32>
    %278 = arith.mulf %258, %268 : vector<8x32xf32>
    %279 = arith.addf %277, %278 : vector<8x32xf32>
    %280 = math.tanh %279 : vector<8x32xf32>
    %281 = arith.mulf %276, %280 : vector<8x32xf32>
    %c0_90 = arith.constant 0 : index
    %c0_91 = arith.constant 0 : index
    %282 = vector.load %arg5[%c0_90, %c0_91] : memref<8x32xf32, #tpu.memory_space<vmem>>, vector<8x32xf32>
    tpu.vector_store %arg5[%c0_90, %c0_91], %281 {strides = array<i32>} : memref<8x32xf32, #tpu.memory_space<vmem>>, vector<8x32xf32>,
    return
  }
  func.func @transform_0(%arg0: i32) -> (i32, i32, i32) {
    %c0_i32 = arith.constant 0 : i32
    %c0_i32_0 = arith.constant 0 : i32
    %c0_i32_1 = arith.constant 0 : i32
    return %c0_i32, %arg0, %c0_i32_0 : i32, i32, i32
  }
  func.func @transform_1(%arg0: i32) -> (i32, i32) {
    %c0_i32 = arith.constant 0 : i32
    %c0_i32_0 = arith.constant 0 : i32
    %c0_i32_1 = arith.constant 0 : i32
    return %c0_i32, %c0_i32_0 : i32, i32
  }
  func.func @transform_2(%arg0: i32) -> (i32, i32) {
    %c0_i32 = arith.constant 0 : i32
    %c0_i32_0 = arith.constant 0 : i32
    %c0_i32_1 = arith.constant 0 : i32
    return %c0_i32, %c0_i32_0 : i32, i32
  }
  func.func @transform_3(%arg0: i32) -> (i32, i32) {
    %c0_i32 = arith.constant 0 : i32
    %c0_i32_0 = arith.constant 0 : i32
    %c0_i32_1 = arith.constant 0 : i32
    return %c0_i32, %c0_i32_0 : i32, i32
  }
  func.func @transform_4(%arg0: i32) -> (i32, i32) {
    %c0_i32 = arith.constant 0 : i32
    %c0_i32_0 = arith.constant 0 : i32
    return %arg0, %c0_i32 : i32, i32
  }
}

</mosaic_0001>

<bundles_post_ra>
// kernel: tpu_custom_call.1
= control target key start
LH: loop header
LB: loop body
LE: loop exit
PB: predicated region body
PF: predicated region fallthrough
CT: control target
= control target key end

     0   :  { %9 = vsyncpa [#allocation3], 0  ;;  %s888_s0 = inlined_call_operand.hbm [shape: f32[8,8,16], index: 0, kind: input, shape index: {}]   ;;  %s889_s1 = inlined_call_operand.hbm [shape: f32[16,128], index: 1, kind: input, shape index: {}]   ;;  %s890_s2 = inlined_call_operand.hbm [shape: f32[32,128], index: 2, kind: input, shape index: {}]   ;;  %s891_s3 = inlined_call_operand.vmem [shape: f32[1,128], index: 3, kind: input, shape index: {}]   ;;  %s892_s4 = inlined_call_operand.hbm [shape: f32[8,32], index: 4, kind: output, shape index: {}]  }
   0x1   :  { %10 = vsyncpa [#allocation6], 0 }
   0x2   :  { %11 = vsyncpa [#allocation4], 0  ;;  %s29_s17 = sshll.u32 %s889_s1, 4  ;;  %s732_s18 = smov [#allocation5]   ;;  %s30_s17 = int_to_ptr.hbm [resolvable:$true] %s29_s17 }
   0x3   :  { %s31_s19 = sshll.u32 %s732_s18, 4  ;;  %s16_s22 = sshll.u32 %s888_s0, 4  ;;  %s32_s19 = int_to_ptr.vmem [resolvable:$true] %s31_s19  ;;  %s17_s22 = int_to_ptr.hbm [resolvable:$true] %s16_s22 }
   0x4   :  { %s733_s23 = smov 128   ;;  %s734_s24 = smov 8  }
   0x5   :  { %37 = dma.hbm_to_vmem [thread:$0]  %s30_s17, 256, %s32_s19, [#allocation6], %s733_s23, %s733_s23, %s734_s24  }
   0x6   :  { %s735_s25 = smov [#allocation2]   ;;  %s42_s29 = sshll.u32 %s890_s2, 4  ;;  %s43_s29 = int_to_ptr.hbm [resolvable:$true] %s42_s29 }
   0x7   :  { %s18_s26 = sshll.u32 %s735_s25, 4  ;;  %s736_s1 = smov [#allocation7]   ;;  %s19_s26 = int_to_ptr.vmem [resolvable:$true] %s18_s26 }
   0x8   :  { %24 = dma.hbm_to_vmem [thread:$0]  %s17_s22, 1024, %s19_s26, [#allocation3], %s733_s23, %s733_s23, %s734_s24  }
   0x9   :  { %s44_s30 = sshll.u32 %s736_s1, 4  ;;  %s45_s30 = int_to_ptr.vmem [resolvable:$true] %s44_s30 }
   0xa   :  { %50 = dma.hbm_to_vmem [thread:$0]  %s43_s29, 512, %s45_s30, [#allocation6], %s733_s23, %s733_s23, %s734_s24  }
   0xb   :  { %726 = dma.done.wait [#allocation3], 1024  }
   0xc   :  { %727 = vsyncadd [#allocation3], 4294966272 }
   0xd   :  { %728 = dma.done.wait [#allocation6], 768  }
   0xe   :  { %729 = vsyncadd [#allocation6], 4294966528  ;;  %v775_v0 = vld [vmem:[#allocation7 + $0x18] sm:$0xff]  ;;  %v777_v2 = vld [vmem:[#allocation7 + $0x10] sm:$0xff]  ;;  %vm79_vm0 = vcmask 130048   ;;  %v737_v7 = vmov 0.0  }
   0xf   :  { %v74_v1 = vld [vmem:[#allocation5 + $0x8] sm:$0xff]  ;;  %165 = vmatpush.msra.mxu1 %v775_v0  ;;  %v73_v3 = vld [vmem:[#allocation5] sm:$0xff]  ;;  %v780_v5 = vld [vmem:[#allocation7 + $0x8] sm:$0xff]  ;;  %213 = vmatpush.msra.mxu2 %v775_v0  ;;  %s738_s5 = smov 64   ;;  %s739_s6 = smov 32   ;;  %vm149_vm1 = vcmask 261120  }
  0x10   :  { %118 = vmatpush.msra.mxu0 %v74_v1  ;;  %v65_v4 = vld [vmem:[#allocation2] sm:$0xff]  ;;  %570 = vmatpush.msra.mxu3 %v74_v1  ;;  %v785_v6 = vld [vmem:[#allocation7] sm:$0xff]  ;;  %v66_v26 = vld [vmem:[#allocation2 + $0x8] sm:$0xff]  ;;  %s544_s10 = sshll.u32 %s892_s4, 4  ;;  %s545_s10 = int_to_ptr.hbm [resolvable:$true] %s544_s10 }
  0x11   :  { %166 = vmatpush.msra.mxu1 %v777_v2  ;;  %214 = vmatpush.msra.mxu2 %v777_v2  ;;  %v811_v8 = vld [vmem:[%s891_s3] ss:$0 sm:$0xff]  ;;  %v70_v43 = vld [vmem:[#allocation2 + $0x28] sm:$0xff]  ;;  %v71_v44 = vld [vmem:[#allocation2 + $0x30] sm:$0xff]  ;;  %s740_s3 = smov [#allocation8]  }
  0x12   :  { %119 = vmatpush.msra.mxu0 %v73_v3  ;;  %571 = vmatpush.msra.mxu3 %v73_v3  ;;  %v72_v45 = vld [vmem:[#allocation2 + $0x38] sm:$0xff]  ;;  %v67_v48 = vld [vmem:[#allocation2 + $0x10] sm:$0xff]  ;;  %s542_s7 = sshll.u32 %s740_s3, 4  ;;  %s543_s7 = int_to_ptr.vmem [resolvable:$true] %s542_s7 }
  0x13   :  { %555 = vmatmul.msk.f32.vlgmr.msra.gmra.mxu0 %vm79_vm0, %v65_v4  ;;  %167 = vmatpush.msra.mxu1 %v780_v5  ;;  %v68_v4 = vld [vmem:[#allocation2 + $0x18] sm:$0xff] }
  0x14   :  { %215 = vmatpush.msra.mxu2 %v780_v5  ;;  %261 = vmatpush.msrb.mxu3 %v775_v0 }
  0x15   :  { %168 = vmatpush.msra.mxu1 %v785_v6  ;;  %560 = vmatmul.msk.f32.vlgmr.msra.gmra.mxu3 %vm79_vm0, %v70_v43 }
  0x16   :  { %169 = vmatmul.f32.vlgmr.msra.gmra.mxu1 %v737_v7  ;;  %216 = vmatpush.msra.mxu2 %v785_v6 }
  0x17   :  { %262 = vmatpush.msrb.mxu3 %v777_v2  ;;  %309 = vmatpush.msrb.mxu1 %v775_v0 }
  0x18   :  { %357 = vmatpush.msrb.mxu2 %v775_v0 }
  0x19   :  { %263 = vmatpush.msrb.mxu3 %v780_v5  ;;  %310 = vmatpush.msrb.mxu1 %v777_v2 }
  0x1a   :  { %358 = vmatpush.msrb.mxu2 %v777_v2 }
  0x1b   :  { %264 = vmatpush.msrb.mxu3 %v785_v6  ;;  %311 = vmatpush.msrb.mxu1 %v780_v5 }
  0x1c   :  { %359 = vmatpush.msrb.mxu2 %v780_v5  ;;  %556 = vmatmul.msk.f32.gmra.mxu0 %vm79_vm0, %v66_v26  ;;  %v69_v26 = vld [vmem:[#allocation2 + $0x20] sm:$0xff] }
  0x1d   :  { %312 = vmatpush.msrb.mxu1 %v785_v6  ;;  %405 = vmatpush.msra.mxu3 %v775_v0 }
  0x1e   :  { %360 = vmatpush.msrb.mxu2 %v785_v6  ;;  %561 = vmatmul.msk.f32.gmra.mxu3 %vm79_vm0, %v71_v44 }
  0x1f   :  { %453 = vmatpush.msra.mxu1 %v775_v0  ;;  %406 = vmatpush.msra.mxu3 %v777_v2 }
  0x21   :  { %454 = vmatpush.msra.mxu1 %v777_v2  ;;  %407 = vmatpush.msra.mxu3 %v780_v5 }
  0x23   :  { %455 = vmatpush.msra.mxu1 %v780_v5  ;;  %408 = vmatpush.msra.mxu3 %v785_v6 }
  0x24   :  { %557 = vmatmul.msk.f32.gmra.mxu0 %vm79_vm0, %v67_v48 }
  0x25   :  { %456 = vmatpush.msra.mxu1 %v785_v6 }
  0x26   :  { %562 = vmatmul.msk.f32.gmra.mxu3 %vm79_vm0, %v72_v45 }
  0x2c   :  { %558 = vmatmul.msk.f32.gmra.mxu0 %vm79_vm0, %v68_v4 }
  0x34   :  { %559 = vmatmul.msk.f32.gmra.mxu0 %vm79_vm0, %v69_v26 }
  0x90   :  { %v121_v9 = vpop.f32.mrf.mxu0 }
  0x91   :  { %v122_v10 = vadd.f32 %v811_v8, %v121_v9 }
  0x93   :  { %v170_v11 = vpop.f32.mrf.mxu1 }
  0x94   :  { %v173_v12 = vadd.f32 %v170_v11, %v122_v10 }
  0x96   :  { %582 = vtanh.f32 %v173_v12  ;;  %v174_v14 = vmul.f32 0.5, %v173_v12 }
  0x98   :  { %584 = vtanh.f32 %v174_v14  ;;  %v838_v50 = vpop.f32.mrf.mxu3 }
  0x99   :  { %v124_v28 = vpop.f32.mrf.mxu0 }
  0x9a   :  { %v125_v29 = vadd.f32 %v811_v8, %v124_v28 }
  0x9c   :  { %v583_v13 = vpop.eup %582 }
  0x9d   :  { %181 = vrot.lane.b32.xlu0 %v583_v13, %s738_s5 }
  0x9e   :  { %v585_v15 = vpop.eup %584 }
  0x9f   :  { %v176_v16 = vadd.f32 1.0, %v585_v15 }
  0xa1   :  { %v177_v17 = vmul.f32 0.5, %v176_v16  ;;  %v840_v51 = vpop.f32.mrf.mxu3  ;;  %v127_v53 = vpop.f32.mrf.mxu0 }
  0xa2   :  { %v128_v54 = vadd.f32 %v811_v8, %v127_v53 }
  0xa3   :  { %v179_v20 = vmul.f32 0.0, %v177_v17 }
  0xa9   :  { %v842_v52 = vpop.f32.mrf.mxu3  ;;  %v130_v9 = vpop.f32.mrf.mxu0 }
  0xaa   :  { %v131_v10 = vadd.f32 %v811_v8, %v130_v9 }
  0xb1   :  { %v133_v28 = vpop.f32.mrf.mxu0 }
 0x10f   :  { %v182_v18 = vpop.permute.xlu0 %181 }
 0x110   :  { %v184_v19 = vmul.f32 %v182_v18, %v177_v17 }
 0x112   :  { %186 = vrot.lane.b32.xlu0 %v184_v19, %s739_s6 }
 0x184   :  { %v187_v21 = vpop.permute.xlu0 %186 }
 0x185   :  { %v189_v22 = vadd.f32 %v187_v21, %v179_v20 }
 0x187   :  { %586 = vtanh.f32 %v189_v22 }
 0x18d   :  { %v587_v23 = vpop.eup %586 }
 0x18e   :  { %192 = vrot.lane.b32.xlu1 %v587_v23, %s738_s5 }
 0x200   :  { %v193_v24 = vpop.permute.xlu1 %192 }
 0x201   :  { %v195_v25 = vmul.f32 %v193_v24, %v177_v17 }
 0x203   :  { %197 = vrot.lane.b32.xlu1 %v195_v25, %s739_s6 }
 0x275   :  { %v198_v27 = vpop.permute.xlu1 %197 }
 0x276   :  { %563 = vmatmul.msk.f32.vlgmr.msra.gmra.mxu2 %vm149_vm1, %v198_v27 }
 0x277   :  { %501 = vmatpush.msra.mxu2 %v775_v0 }
 0x279   :  { %502 = vmatpush.msra.mxu2 %v777_v2 }
 0x27b   :  { %503 = vmatpush.msra.mxu2 %v780_v5 }
 0x27d   :  { %504 = vmatpush.msra.mxu2 %v785_v6 }
 0x2f9   :  { %v218_v30 = vpop.f32.mrf.mxu2 }
 0x2fa   :  { %v221_v31 = vadd.f32 %v218_v30, %v125_v29  ;;  %v134_v29 = vadd.f32 %v811_v8, %v133_v28 }
 0x2fc   :  { %588 = vtanh.f32 %v221_v31  ;;  %v222_v33 = vmul.f32 0.5, %v221_v31 }
 0x2fe   :  { %590 = vtanh.f32 %v222_v33 }
 0x302   :  { %v589_v32 = vpop.eup %588 }
 0x303   :  { %229 = vrot.lane.b32.xlu2 %v589_v32, %s738_s5 }
 0x304   :  { %v591_v34 = vpop.eup %590 }
 0x305   :  { %v224_v35 = vadd.f32 1.0, %v591_v34 }
 0x307   :  { %v225_v36 = vmul.f32 0.5, %v224_v35 }
 0x309   :  { %v227_v39 = vmul.f32 %v225_v36, %v189_v22 }
 0x35d   :  { %v230_v37 = vpop.permute.xlu2 %229 }
 0x35e   :  { %v232_v38 = vmul.f32 %v230_v37, %v225_v36 }
 0x360   :  { %234 = vrot.lane.b32.xlu2 %v232_v38, %s739_s6 }
 0x3ba   :  { %v235_v40 = vpop.permute.xlu2 %234 }
 0x3bb   :  { %v237_v41 = vadd.f32 %v235_v40, %v227_v39 }
 0x3bd   :  { %592 = vtanh.f32 %v237_v41 }
 0x3c3   :  { %v593_v42 = vpop.eup %592 }
 0x3c4   :  { %240 = vrot.lane.b32.xlu0 %v593_v42, %s738_s5 }
 0x436   :  { %v241_v46 = vpop.permute.xlu0 %240 }
 0x437   :  { %v243_v47 = vmul.f32 %v241_v46, %v225_v36  ;;  %v137_v46 = vadd.f32 %v811_v8, %v838_v50 }
 0x439   :  { %245 = vrot.lane.b32.xlu1 %v243_v47, %s739_s6 }
 0x4ab   :  { %v246_v49 = vpop.permute.xlu1 %245 }
 0x4ac   :  { %564 = vmatmul.msk.f32.vlgmr.msrb.gmra.mxu3 %vm149_vm1, %v246_v49 }
 0x52f   :  { %v266_v55 = vpop.f32.mrf.mxu3 }
 0x530   :  { %v269_v56 = vadd.f32 %v266_v55, %v128_v54 }
 0x532   :  { %594 = vtanh.f32 %v269_v56  ;;  %v270_v58 = vmul.f32 0.5, %v269_v56 }
 0x534   :  { %596 = vtanh.f32 %v270_v58 }
 0x538   :  { %v595_v57 = vpop.eup %594 }
 0x539   :  { %277 = vrot.lane.b32.xlu2 %v595_v57, %s738_s5 }
 0x53a   :  { %v597_v59 = vpop.eup %596 }
 0x53b   :  { %v272_v60 = vadd.f32 1.0, %v597_v59 }
 0x53d   :  { %v273_v61 = vmul.f32 0.5, %v272_v60 }
 0x53f   :  { %v275_v0 = vmul.f32 %v273_v61, %v237_v41 }
 0x593   :  { %v278_v62 = vpop.permute.xlu2 %277 }
 0x594   :  { %v280_v63 = vmul.f32 %v278_v62, %v273_v61 }
 0x596   :  { %282 = vrot.lane.b32.xlu0 %v280_v63, %s739_s6 }
 0x608   :  { %v283_v1 = vpop.permute.xlu0 %282 }
 0x609   :  { %v285_v2 = vadd.f32 %v283_v1, %v275_v0  ;;  %v140_v1 = vadd.f32 %v811_v8, %v840_v51 }
 0x60b   :  { %598 = vtanh.f32 %v285_v2 }
 0x611   :  { %v599_v3 = vpop.eup %598 }
 0x612   :  { %288 = vrot.lane.b32.xlu1 %v599_v3, %s738_s5 }
 0x684   :  { %v289_v5 = vpop.permute.xlu1 %288 }
 0x685   :  { %v291_v6 = vmul.f32 %v289_v5, %v273_v61 }
 0x687   :  { %293 = vrot.lane.b32.xlu2 %v291_v6, %s739_s6 }
 0x6e1   :  { %v294_v7 = vpop.permute.xlu2 %293 }
 0x6e2   :  { %565 = vmatmul.msk.f32.vlgmr.msrb.gmra.mxu1 %vm149_vm1, %v294_v7 }
 0x75f   :  { %v314_v11 = vpop.f32.mrf.mxu1 }
 0x760   :  { %v317_v12 = vadd.f32 %v314_v11, %v131_v10 }
 0x762   :  { %600 = vtanh.f32 %v317_v12  ;;  %v318_v14 = vmul.f32 0.5, %v317_v12 }
 0x764   :  { %602 = vtanh.f32 %v318_v14 }
 0x768   :  { %v601_v13 = vpop.eup %600 }
 0x769   :  { %325 = vrot.lane.b32.xlu0 %v601_v13, %s738_s5 }
 0x76a   :  { %v603_v15 = vpop.eup %602 }
 0x76b   :  { %v320_v16 = vadd.f32 1.0, %v603_v15 }
 0x76d   :  { %v321_v17 = vmul.f32 0.5, %v320_v16 }
 0x76f   :  { %v323_v20 = vmul.f32 %v321_v17, %v285_v2 }
 0x7db   :  { %v326_v18 = vpop.permute.xlu0 %325 }
 0x7dc   :  { %v328_v19 = vmul.f32 %v326_v18, %v321_v17  ;;  %v143_v18 = vadd.f32 %v811_v8, %v842_v52 }
 0x7de   :  { %330 = vrot.lane.b32.xlu1 %v328_v19, %s739_s6 }
 0x850   :  { %v331_v21 = vpop.permute.xlu1 %330 }
 0x851   :  { %v333_v22 = vadd.f32 %v331_v21, %v323_v20 }
 0x853   :  { %604 = vtanh.f32 %v333_v22 }
 0x859   :  { %v605_v23 = vpop.eup %604 }
 0x85a   :  { %336 = vrot.lane.b32.xlu2 %v605_v23, %s738_s5 }
 0x8b4   :  { %v337_v24 = vpop.permute.xlu2 %336 }
 0x8b5   :  { %v339_v25 = vmul.f32 %v337_v24, %v321_v17 }
 0x8b7   :  { %341 = vrot.lane.b32.xlu0 %v339_v25, %s739_s6 }
 0x929   :  { %v342_v27 = vpop.permute.xlu0 %341 }
 0x92a   :  { %566 = vmatmul.msk.f32.vlgmr.msrb.gmra.mxu2 %vm149_vm1, %v342_v27 }
 0x9ad   :  { %v362_v30 = vpop.f32.mrf.mxu2 }
 0x9ae   :  { %v365_v31 = vadd.f32 %v362_v30, %v134_v29 }
 0x9b0   :  { %606 = vtanh.f32 %v365_v31  ;;  %v366_v33 = vmul.f32 0.5, %v365_v31 }
 0x9b2   :  { %608 = vtanh.f32 %v366_v33 }
 0x9b6   :  { %v607_v32 = vpop.eup %606 }
 0x9b7   :  { %373 = vrot.lane.b32.xlu1 %v607_v32, %s738_s5 }
 0x9b8   :  { %v609_v34 = vpop.eup %608 }
 0x9b9   :  { %v368_v35 = vadd.f32 1.0, %v609_v34 }
 0x9bb   :  { %v369_v36 = vmul.f32 0.5, %v368_v35 }
 0x9bd   :  { %v371_v39 = vmul.f32 %v369_v36, %v333_v22 }
 0xa29   :  { %v374_v37 = vpop.permute.xlu1 %373 }
 0xa2a   :  { %v376_v38 = vmul.f32 %v374_v37, %v369_v36 }
 0xa2c   :  { %378 = vrot.lane.b32.xlu2 %v376_v38, %s739_s6 }
 0xa86   :  { %v379_v40 = vpop.permute.xlu2 %378 }
 0xa87   :  { %v381_v41 = vadd.f32 %v379_v40, %v371_v39 }
 0xa89   :  { %610 = vtanh.f32 %v381_v41 }
 0xa8f   :  { %v611_v42 = vpop.eup %610 }
 0xa90   :  { %384 = vrot.lane.b32.xlu0 %v611_v42, %s738_s5 }
 0xb02   :  { %v385_v43 = vpop.permute.xlu0 %384 }
 0xb03   :  { %v387_v44 = vmul.f32 %v385_v43, %v369_v36 }
 0xb05   :  { %389 = vrot.lane.b32.xlu1 %v387_v44, %s739_s6 }
 0xb77   :  { %v390_v45 = vpop.permute.xlu1 %389 }
 0xb78   :  { %567 = vmatmul.msk.f32.vlgmr.msra.gmra.mxu3 %vm149_vm1, %v390_v45 }
 0xbfb   :  { %v410_v47 = vpop.f32.mrf.mxu3 }
 0xbfc   :  { %v413_v48 = vadd.f32 %v410_v47, %v137_v46 }
 0xbfe   :  { %612 = vtanh.f32 %v413_v48  ;;  %v414_v53 = vmul.f32 0.5, %v413_v48 }
 0xc00   :  { %614 = vtanh.f32 %v414_v53 }
 0xc04   :  { %v613_v49 = vpop.eup %612 }
 0xc05   :  { %421 = vrot.lane.b32.xlu2 %v613_v49, %s738_s5 }
 0xc06   :  { %v615_v54 = vpop.eup %614 }
 0xc07   :  { %v416_v55 = vadd.f32 1.0, %v615_v54 }
 0xc09   :  { %v417_v56 = vmul.f32 0.5, %v416_v55 }
 0xc0b   :  { %v419_v59 = vmul.f32 %v417_v56, %v381_v41 }
 0xc5f   :  { %v422_v57 = vpop.permute.xlu2 %421 }
 0xc60   :  { %v424_v58 = vmul.f32 %v422_v57, %v417_v56 }
 0xc62   :  { %426 = vrot.lane.b32.xlu0 %v424_v58, %s739_s6 }
 0xcd4   :  { %v427_v60 = vpop.permute.xlu0 %426 }
 0xcd5   :  { %v429_v61 = vadd.f32 %v427_v60, %v419_v59 }
 0xcd7   :  { %616 = vtanh.f32 %v429_v61 }
 0xcdd   :  { %v617_v50 = vpop.eup %616 }
 0xcde   :  { %432 = vrot.lane.b32.xlu1 %v617_v50, %s738_s5 }
 0xd50   :  { %v433_v62 = vpop.permute.xlu1 %432 }
 0xd51   :  { %v435_v63 = vmul.f32 %v433_v62, %v417_v56 }
 0xd53   :  { %437 = vrot.lane.b32.xlu2 %v435_v63, %s739_s6 }
 0xdad   :  { %v438_v0 = vpop.permute.xlu2 %437 }
 0xdae   :  { %568 = vmatmul.msk.f32.vlgmr.msra.gmra.mxu1 %vm149_vm1, %v438_v0 }
 0xe2b   :  { %v458_v2 = vpop.f32.mrf.mxu1 }
 0xe2c   :  { %v461_v3 = vadd.f32 %v458_v2, %v140_v1 }
 0xe2e   :  { %618 = vtanh.f32 %v461_v3  ;;  %v462_v5 = vmul.f32 0.5, %v461_v3 }
 0xe30   :  { %620 = vtanh.f32 %v462_v5 }
 0xe34   :  { %v619_v4 = vpop.eup %618 }
 0xe35   :  { %469 = vrot.lane.b32.xlu0 %v619_v4, %s738_s5 }
 0xe36   :  { %v621_v6 = vpop.eup %620 }
 0xe37   :  { %v464_v7 = vadd.f32 1.0, %v621_v6 }
 0xe39   :  { %v465_v9 = vmul.f32 0.5, %v464_v7 }
 0xe3b   :  { %v467_v12 = vmul.f32 %v465_v9, %v429_v61 }
 0xea7   :  { %v470_v10 = vpop.permute.xlu0 %469 }
 0xea8   :  { %v472_v11 = vmul.f32 %v470_v10, %v465_v9 }
 0xeaa   :  { %474 = vrot.lane.b32.xlu1 %v472_v11, %s739_s6 }
 0xf1c   :  { %v475_v13 = vpop.permute.xlu1 %474 }
 0xf1d   :  { %v477_v14 = vadd.f32 %v475_v13, %v467_v12 }
 0xf1f   :  { %622 = vtanh.f32 %v477_v14 }
 0xf25   :  { %v623_v51 = vpop.eup %622 }
 0xf26   :  { %480 = vrot.lane.b32.xlu2 %v623_v51, %s738_s5 }
 0xf80   :  { %v481_v15 = vpop.permute.xlu2 %480 }
 0xf81   :  { %v483_v16 = vmul.f32 %v481_v15, %v465_v9 }
 0xf83   :  { %485 = vrot.lane.b32.xlu0 %v483_v16, %s739_s6 }
 0xff5   :  { %v486_v17 = vpop.permute.xlu0 %485 }
 0xff6   :  { %569 = vmatmul.msk.f32.vlgmr.msra.gmra.mxu2 %vm149_vm1, %v486_v17 }
0x1079   :  { %v506_v19 = vpop.f32.mrf.mxu2 }
0x107a   :  { %v509_v20 = vadd.f32 %v506_v19, %v143_v18 }
0x107c   :  { %624 = vtanh.f32 %v509_v20  ;;  %v510_v22 = vmul.f32 0.5, %v509_v20 }
0x107e   :  { %626 = vtanh.f32 %v510_v22 }
0x1082   :  { %v625_v21 = vpop.eup %624 }
0x1083   :  { %517 = vrot.lane.b32.xlu1 %v625_v21, %s738_s5 }
0x1084   :  { %v627_v23 = vpop.eup %626 }
0x1085   :  { %v512_v24 = vadd.f32 1.0, %v627_v23 }
0x1087   :  { %v513_v25 = vmul.f32 0.5, %v512_v24 }
0x1089   :  { %v515_v28 = vmul.f32 %v513_v25, %v477_v14 }
0x10f5   :  { %v518_v26 = vpop.permute.xlu1 %517 }
0x10f6   :  { %v520_v27 = vmul.f32 %v518_v26, %v513_v25 }
0x10f8   :  { %522 = vrot.lane.b32.xlu2 %v520_v27, %s739_s6 }
0x1152   :  { %v523_v29 = vpop.permute.xlu2 %522 }
0x1153   :  { %v525_v30 = vadd.f32 %v523_v29, %v515_v28 }
0x1155   :  { %628 = vtanh.f32 %v525_v30 }
0x115b   :  { %v629_v8 = vpop.eup %628 }
0x115c   :  { %528 = vrot.lane.b32.xlu0 %v629_v8, %s738_s5 }
0x11ce   :  { %v529_v52 = vpop.permute.xlu0 %528 }
0x11cf   :  { %v531_v31 = vmul.f32 %v529_v52, %v513_v25 }
0x11d1   :  { %533 = vrot.lane.b32.xlu1 %v531_v31, %s739_s6 }
0x1243   :  { %v534_v32 = vpop.permute.xlu1 %533 }
0x1244   :  { %536 = vst.msk [vmem:[#allocation8] sm:$0xff] %vm149_vm1, %v534_v32 }
0x1245   :  { %547 = dma.vmem_to_hbm [thread:$0]  %s543_s7, 128, %s545_s10, [#allocation4]  }
0x1246   :  { %730 = dma.done.wait [#allocation4], 128  }
0x1247   :  { %731 = vsyncadd [#allocation4], 4294967168 }
0x1248   :  { %552 = vsyncpa [#allocation3], 1 }
0x1249   :  { %553 = vsyncpa [#allocation6], 1 }
0x124a   :  { %554 = vsyncpa [#allocation4], 1 }

</bundles_post_ra>
